<compile_context>
chip_gen: v5e
topology: v5e:2x2
jax: 0.10.0
libtpu: 0.0.40
codegen_flags: <defaults>
</compile_context>

<pallas_src>
import functools

import jax
import jax.numpy as jnp
from jax.experimental import pallas as pl
from jax.experimental.pallas import tpu as pltpu


_LANE = 128
_MAX_HW_TILE = 32768  # lanes; ~1.5 MiB per block at C_in=4, C_out=8, f32


@functools.lru_cache(maxsize=None)
def _vmem_budget_and_limit():
    """(double-buffered block budget, scoped vmem_limit_bytes) for this chip."""
    try:
        cap = int(getattr(pltpu.get_tpu_info(), "vmem_capacity_bytes", 0)) or 64 * 2**20
    except Exception:  # no hardware info available (e.g. interpret mode)
        cap = 64 * 2**20
    # Keep the pipelined working set well under physical VMEM:
    #   v7x (64 MiB physical)  -> 32 MiB block budget, 40 MiB scoped limit
    #   v5e/v6e (128 MiB)      -> 48 MiB block budget, 56 MiB scoped limit
    budget = min(cap // 2, 48 * 2**20)
    limit = min(budget + 8 * 2**20, (cap * 3) // 4)
    return budget, limit


def _choose_hw_tile(hw, c_in, c_out, in_itemsize, out_itemsize, budget):
    """Largest lane-dense spatial tile whose double-buffered blocks fit VMEM."""
    per_lane = 2 * (c_in * in_itemsize + c_out * out_itemsize)  # 2x: double buffer
    cap = (budget // max(1, per_lane)) // _LANE * _LANE
    cap = max(512, min(_MAX_HW_TILE, cap))
    if hw <= cap:
        return hw   # single full-extent block (no 128-divisibility requirement)
    return cap      # multiple of 128, >= 512; boundary block handled by Pallas


def _pointwise_conv_relu_kernel(x_ref, wt_ref, b_ref, o_ref):
    """One block: y = relu(W^T @ x + b), spatial positions on the lanes.

    x_ref:  (C_in, HW_tile)   one batch element, one spatial tile
    wt_ref: (C_out, C_in)     transposed 1x1-conv weight (resident across grid)
    b_ref:  (C_out, 1)        bias (resident across grid)
    o_ref:  (C_out, HW_tile)
    """
    x = x_ref[...]
    if x.dtype != jnp.float32:
        # Non-f32 inputs (e.g. bf16): accumulate in f32 (v5e has no bf16 VALU).
        x = x.astype(jnp.float32)
    wt = wt_ref[...]
    if wt.dtype != jnp.float32:
        wt = wt.astype(jnp.float32)
    b = b_ref[...]
    if b.dtype != jnp.float32:
        b = b.astype(jnp.float32)

    c_out, c_in = wt.shape
    hw = x.shape[-1]

    if c_in >= 32:
        # Realistic channel counts: MXU matmul.
        acc = jnp.dot(wt, x, preferred_element_type=jnp.float32) + b
    else:
        # Degenerate contraction (K ~ 4): unrolled VPU broadcast-FMA; the few
        # per-step XLU broadcasts are hidden under the HBM DMA.
        acc = jnp.broadcast_to(b, (c_out, hw))
        for k in range(c_in):           # static unroll, C_in is tiny
            acc = acc + wt[:, k:k + 1] * x[k:k + 1, :]

    o_ref[...] = jnp.maximum(acc, 0.0).astype(o_ref.dtype)


def _pointwise_conv_relu(x3, wt, b2, hw_tile, vmem_limit):
    """x3: (N, C_in, HW) -> (N, C_out, HW) with y = relu(conv1x1(x) + b)."""
    n, c_in, hw = x3.shape
    c_out = wt.shape[0]
    nhw = pl.cdiv(hw, hw_tile)

    # TODO(synk): emitting the output in bf16 would halve the dominant HBM
    # write traffic, but we keep out_dtype == in_dtype to match the PyTorch
    # module's semantics exactly.
    out_dtype = x3.dtype
    in_bytes = x3.dtype.itemsize
    out_bytes = jnp.dtype(out_dtype).itemsize
    cost = pl.CostEstimate(
        flops=2 * n * hw * c_in * c_out,
        transcendentals=0,
        bytes_accessed=n * hw * (c_in * in_bytes + c_out * out_bytes)
        + (c_out * c_in + c_out) * wt.dtype.itemsize,
    )

    return pl.pallas_call(
        _pointwise_conv_relu_kernel,
        out_shape=jax.ShapeDtypeStruct((n, c_out, hw), out_dtype),
        grid_spec=pltpu.PrefetchScalarGridSpec(
            num_scalar_prefetch=0,
            grid=(n, nhw),
            in_specs=[
                # Leading batch dim squeezed -> 2-D refs in the kernel.
                pl.BlockSpec((None, c_in, hw_tile), lambda i, j: (i, 0, j)),
                pl.BlockSpec((c_out, c_in), lambda i, j: (0, 0)),
                pl.BlockSpec((c_out, 1), lambda i, j: (0, 0)),
            ],
            out_specs=pl.BlockSpec((None, c_out, hw_tile), lambda i, j: (i, 0, j)),
        ),
        compiler_params=pltpu.CompilerParams(
            dimension_semantics=("parallel", "parallel"),
            vmem_limit_bytes=vmem_limit,
        ),
        cost_estimate=cost,
    )(x3, wt, b2)


@jax.jit
def _decoder_forward_jit(features, weight, bias):
    """features: tuple of NCHW maps; weight: (C_in, C_out); bias: (C_out,)."""
    c_in, c_out = weight.shape
    wt = weight.T                      # (C_out, C_in), once per trace
    b2 = bias.reshape(c_out, 1)

    budget, vmem_limit = _vmem_budget_and_limit()

    new_features = []
    for f in features:
        n, fc, fh, fw = f.shape
        assert fc == c_in, "feature channels must match the wrapped module"
        hw = fh * fw
        x3 = f.reshape(n, fc, hw)      # NCHW -> (N, C, HW): free reshape, no copy
        hw_tile = _choose_hw_tile(
            hw, c_in, c_out, f.dtype.itemsize, f.dtype.itemsize, budget)
        y3 = _pointwise_conv_relu(x3, wt, b2, hw_tile, vmem_limit)
        new_features.append(y3.reshape(n, c_out, fh, fw))
    return tuple(new_features)


def decoder_module_wrapper_forward(features, inputs, weight, bias):
    """Pallas equivalent of DecoderModuleWrapper.forward.

    Args:
        features: list of NCHW feature maps (different spatial resolutions).
        inputs: original inputs (ignored, as in the PyTorch module).
        weight: (C_in, C_out) pointwise-conv weight of the wrapped module.
        bias:   (C_out,) bias of the wrapped module.

    Returns:
        list of new NCHW feature maps with C_out channels.
    """
    del inputs  # ignored, matching the PyTorch forward
    if not features:
        return []
    # TODO(synk): the PyTorch wrapper accepts an arbitrary nn.Module; here the
    # wrapped module is fixed to a 1x1 conv + bias + ReLU feature processor.
    return list(_decoder_forward_jit(tuple(features), weight, bias))


if __name__ == "__main__":
    key = jax.random.PRNGKey(0)
    k_feat0, k_feat1, k_feat2, k_w, k_b = jax.random.split(key, 5)

    N, C_IN, C_OUT = 2, 4, 8

    # Multi-scale features (NCHW), as a decoder would receive.
    features = [
        jax.random.normal(k_feat0, (N, C_IN, 16, 16), dtype=jnp.float32),
        jax.random.normal(k_feat1, (N, C_IN, 8, 8), dtype=jnp.float32),
        jax.random.normal(k_feat2, (N, C_IN, 4, 4), dtype=jnp.float32),
    ]
    # Original inputs (ignored by the wrapper).
    inputs = [jax.random.normal(key, (N, 3, 16, 16), dtype=jnp.float32)]

    # Deterministic parameters of the wrapped 1x1 conv module.
    weight = jax.random.normal(k_w, (C_IN, C_OUT), dtype=jnp.float32) * 0.1
    bias = jax.random.normal(k_b, (C_OUT,), dtype=jnp.float32) * 0.1

    new_features = decoder_module_wrapper_forward(features, inputs, weight, bias)
    for y in new_features:
        jax.block_until_ready(y)

    # Reference check (plain JAX) to ensure correctness of the kernel path.
    for feat_map, y in zip(features, new_features):
        ref = jnp.einsum("nchw,cd->ndhw", feat_map, weight) \
            + bias[None, :, None, None]
        ref = jnp.maximum(ref, 0.0)
        assert y.shape == ref.shape
        assert jnp.allclose(y, ref, atol=1e-5, rtol=1e-5)

    print("KERNEL_OK")
</pallas_src>

<mosaic_0001>
module attributes {stable_mosaic.version = 11 : i64} {
  func.func @_pointwise_conv_relu_kernel(%arg0: i32, %arg1: i32, %arg2: memref<1x4x256xf32, #tpu.memory_space<vmem>>, %arg3: memref<8x4xf32, #tpu.memory_space<vmem>>, %arg4: memref<8x1xf32, #tpu.memory_space<vmem>>, %arg5: memref<1x8x256xf32, #tpu.memory_space<vmem>>) attributes {dimension_semantics = [#tpu.dimension_semantics<parallel>, #tpu.dimension_semantics<parallel>], iteration_bounds = array<i64: 2, 1>, scalar_prefetch = 0 : i64, scratch_operands = 0 : i64, tpu.core_type = #tpu.core_type<tc>, window_params = [{transform_indices = @transform_0, window_bounds = array<i64: 1, 4, 256>}, {pipeline_mode = #tpu.pipeline_mode<synchronous>, transform_indices = @transform_1, window_bounds = array<i64: 8, 4>}, {pipeline_mode = #tpu.pipeline_mode<synchronous>, transform_indices = @transform_2, window_bounds = array<i64: 8, 1>}, {transform_indices = @transform_3, window_bounds = array<i64: 1, 8, 256>}]} {
    %c0 = arith.constant 0 : index
    %c0_0 = arith.constant 0 : index
    %c0_1 = arith.constant 0 : index
    %0 = vector.load %arg2[%c0, %c0_0, %c0_1] : memref<1x4x256xf32, #tpu.memory_space<vmem>>, vector<1x4x256xf32>
    %1 = vector.shape_cast %0 : vector<1x4x256xf32> to vector<4x256xf32>
    %c0_2 = arith.constant 0 : index
    %c0_3 = arith.constant 0 : index
    %2 = vector.load %arg3[%c0_2, %c0_3] : memref<8x4xf32, #tpu.memory_space<vmem>>, vector<8x4xf32>
    %c0_4 = arith.constant 0 : index
    %c0_5 = arith.constant 0 : index
    %3 = vector.load %arg4[%c0_4, %c0_5] : memref<8x1xf32, #tpu.memory_space<vmem>>, vector<8x1xf32>
    %4 = vector.shape_cast %3 : vector<8x1xf32> to vector<8x1xf32>
    %5 = vector.broadcast %4 : vector<8x1xf32> to vector<8x256xf32>
    %6 = vector.extract_strided_slice %2 {offsets = [0, 0], sizes = [8, 1], strides = [1, 1]} : vector<8x4xf32> to vector<8x1xf32>
    %7 = vector.extract_strided_slice %1 {offsets = [0, 0], sizes = [1, 256], strides = [1, 1]} : vector<4x256xf32> to vector<1x256xf32>
    %8 = vector.broadcast %6 : vector<8x1xf32> to vector<8x256xf32>
    %9 = vector.broadcast %7 : vector<1x256xf32> to vector<8x256xf32>
    %10 = arith.mulf %8, %9 : vector<8x256xf32>
    %11 = arith.addf %5, %10 : vector<8x256xf32>
    %12 = vector.extract_strided_slice %2 {offsets = [0, 1], sizes = [8, 1], strides = [1, 1]} : vector<8x4xf32> to vector<8x1xf32>
    %13 = vector.extract_strided_slice %1 {offsets = [1, 0], sizes = [1, 256], strides = [1, 1]} : vector<4x256xf32> to vector<1x256xf32>
    %14 = vector.broadcast %12 : vector<8x1xf32> to vector<8x256xf32>
    %15 = vector.broadcast %13 : vector<1x256xf32> to vector<8x256xf32>
    %16 = arith.mulf %14, %15 : vector<8x256xf32>
    %17 = arith.addf %11, %16 : vector<8x256xf32>
    %18 = vector.extract_strided_slice %2 {offsets = [0, 2], sizes = [8, 1], strides = [1, 1]} : vector<8x4xf32> to vector<8x1xf32>
    %19 = vector.extract_strided_slice %1 {offsets = [2, 0], sizes = [1, 256], strides = [1, 1]} : vector<4x256xf32> to vector<1x256xf32>
    %20 = vector.broadcast %18 : vector<8x1xf32> to vector<8x256xf32>
    %21 = vector.broadcast %19 : vector<1x256xf32> to vector<8x256xf32>
    %22 = arith.mulf %20, %21 : vector<8x256xf32>
    %23 = arith.addf %17, %22 : vector<8x256xf32>
    %24 = vector.extract_strided_slice %2 {offsets = [0, 3], sizes = [8, 1], strides = [1, 1]} : vector<8x4xf32> to vector<8x1xf32>
    %25 = vector.extract_strided_slice %1 {offsets = [3, 0], sizes = [1, 256], strides = [1, 1]} : vector<4x256xf32> to vector<1x256xf32>
    %26 = vector.broadcast %24 : vector<8x1xf32> to vector<8x256xf32>
    %27 = vector.broadcast %25 : vector<1x256xf32> to vector<8x256xf32>
    %28 = arith.mulf %26, %27 : vector<8x256xf32>
    %29 = arith.addf %23, %28 : vector<8x256xf32>
    %cst = arith.constant 0.000000e+00 : f32
    %30 = vector.broadcast %cst : f32 to vector<8x256xf32>
    %31 = arith.maximumf %29, %30 : vector<8x256xf32>
    %c0_6 = arith.constant 0 : index
    %c0_7 = arith.constant 0 : index
    %c0_8 = arith.constant 0 : index
    %32 = vector.load %arg5[%c0_6, %c0_7, %c0_8] : memref<1x8x256xf32, #tpu.memory_space<vmem>>, vector<1x8x256xf32>
    %33 = vector.shape_cast %32 : vector<1x8x256xf32> to vector<8x256xf32>
    %34 = vector.shape_cast %31 : vector<8x256xf32> to vector<1x8x256xf32>
    tpu.vector_store %arg5[%c0_6, %c0_7, %c0_8], %34 {strides = array<i32>} : memref<1x8x256xf32, #tpu.memory_space<vmem>>, vector<1x8x256xf32>,
    return
  }
  func.func @transform_0(%arg0: i32, %arg1: i32) -> (i32, i32, i32) {
    %c0_i32 = arith.constant 0 : i32
    %c0_i32_0 = arith.constant 0 : i32
    return %arg0, %c0_i32, %arg1 : i32, i32, i32
  }
  func.func @transform_1(%arg0: i32, %arg1: i32) -> (i32, i32) {
    %c0_i32 = arith.constant 0 : i32
    %c0_i32_0 = arith.constant 0 : i32
    %c0_i32_1 = arith.constant 0 : i32
    return %c0_i32, %c0_i32_0 : i32, i32
  }
  func.func @transform_2(%arg0: i32, %arg1: i32) -> (i32, i32) {
    %c0_i32 = arith.constant 0 : i32
    %c0_i32_0 = arith.constant 0 : i32
    %c0_i32_1 = arith.constant 0 : i32
    return %c0_i32, %c0_i32_0 : i32, i32
  }
  func.func @transform_3(%arg0: i32, %arg1: i32) -> (i32, i32, i32) {
    %c0_i32 = arith.constant 0 : i32
    %c0_i32_0 = arith.constant 0 : i32
    return %arg0, %c0_i32, %arg1 : i32, i32, i32
  }
}

module attributes {stable_mosaic.version = 11 : i64} {
  func.func @_pointwise_conv_relu_kernel(%arg0: i32, %arg1: i32, %arg2: memref<1x4x16xf32, #tpu.memory_space<vmem>>, %arg3: memref<8x4xf32, #tpu.memory_space<vmem>>, %arg4: memref<8x1xf32, #tpu.memory_space<vmem>>, %arg5: memref<1x8x16xf32, #tpu.memory_space<vmem>>) attributes {dimension_semantics = [#tpu.dimension_semantics<parallel>, #tpu.dimension_semantics<parallel>], iteration_bounds = array<i64: 2, 1>, scalar_prefetch = 0 : i64, scratch_operands = 0 : i64, tpu.core_type = #tpu.core_type<tc>, window_params = [{transform_indices = @transform_0, window_bounds = array<i64: 1, 4, 16>}, {pipeline_mode = #tpu.pipeline_mode<synchronous>, transform_indices = @transform_1, window_bounds = array<i64: 8, 4>}, {pipeline_mode = #tpu.pipeline_mode<synchronous>, transform_indices = @transform_2, window_bounds = array<i64: 8, 1>}, {transform_indices = @transform_3, window_bounds = array<i64: 1, 8, 16>}]} {
    %c0 = arith.constant 0 : index
    %c0_0 = arith.constant 0 : index
    %c0_1 = arith.constant 0 : index
    %0 = vector.load %arg2[%c0, %c0_0, %c0_1] : memref<1x4x16xf32, #tpu.memory_space<vmem>>, vector<1x4x16xf32>
    %1 = vector.shape_cast %0 : vector<1x4x16xf32> to vector<4x16xf32>
    %c0_2 = arith.constant 0 : index
    %c0_3 = arith.constant 0 : index
    %2 = vector.load %arg3[%c0_2, %c0_3] : memref<8x4xf32, #tpu.memory_space<vmem>>, vector<8x4xf32>
    %c0_4 = arith.constant 0 : index
    %c0_5 = arith.constant 0 : index
    %3 = vector.load %arg4[%c0_4, %c0_5] : memref<8x1xf32, #tpu.memory_space<vmem>>, vector<8x1xf32>
    %4 = vector.shape_cast %3 : vector<8x1xf32> to vector<8x1xf32>
    %5 = vector.broadcast %4 : vector<8x1xf32> to vector<8x16xf32>
    %6 = vector.extract_strided_slice %2 {offsets = [0, 0], sizes = [8, 1], strides = [1, 1]} : vector<8x4xf32> to vector<8x1xf32>
    %7 = vector.extract_strided_slice %1 {offsets = [0, 0], sizes = [1, 16], strides = [1, 1]} : vector<4x16xf32> to vector<1x16xf32>
    %8 = vector.broadcast %6 : vector<8x1xf32> to vector<8x16xf32>
    %9 = vector.broadcast %7 : vector<1x16xf32> to vector<8x16xf32>
    %10 = arith.mulf %8, %9 : vector<8x16xf32>
    %11 = arith.addf %5, %10 : vector<8x16xf32>
    %12 = vector.extract_strided_slice %2 {offsets = [0, 1], sizes = [8, 1], strides = [1, 1]} : vector<8x4xf32> to vector<8x1xf32>
    %13 = vector.extract_strided_slice %1 {offsets = [1, 0], sizes = [1, 16], strides = [1, 1]} : vector<4x16xf32> to vector<1x16xf32>
    %14 = vector.broadcast %12 : vector<8x1xf32> to vector<8x16xf32>
    %15 = vector.broadcast %13 : vector<1x16xf32> to vector<8x16xf32>
    %16 = arith.mulf %14, %15 : vector<8x16xf32>
    %17 = arith.addf %11, %16 : vector<8x16xf32>
    %18 = vector.extract_strided_slice %2 {offsets = [0, 2], sizes = [8, 1], strides = [1, 1]} : vector<8x4xf32> to vector<8x1xf32>
    %19 = vector.extract_strided_slice %1 {offsets = [2, 0], sizes = [1, 16], strides = [1, 1]} : vector<4x16xf32> to vector<1x16xf32>
    %20 = vector.broadcast %18 : vector<8x1xf32> to vector<8x16xf32>
    %21 = vector.broadcast %19 : vector<1x16xf32> to vector<8x16xf32>
    %22 = arith.mulf %20, %21 : vector<8x16xf32>
    %23 = arith.addf %17, %22 : vector<8x16xf32>
    %24 = vector.extract_strided_slice %2 {offsets = [0, 3], sizes = [8, 1], strides = [1, 1]} : vector<8x4xf32> to vector<8x1xf32>
    %25 = vector.extract_strided_slice %1 {offsets = [3, 0], sizes = [1, 16], strides = [1, 1]} : vector<4x16xf32> to vector<1x16xf32>
    %26 = vector.broadcast %24 : vector<8x1xf32> to vector<8x16xf32>
    %27 = vector.broadcast %25 : vector<1x16xf32> to vector<8x16xf32>
    %28 = arith.mulf %26, %27 : vector<8x16xf32>
    %29 = arith.addf %23, %28 : vector<8x16xf32>
    %cst = arith.constant 0.000000e+00 : f32
    %30 = vector.broadcast %cst : f32 to vector<8x16xf32>
    %31 = arith.maximumf %29, %30 : vector<8x16xf32>
    %c0_6 = arith.constant 0 : index
    %c0_7 = arith.constant 0 : index
    %c0_8 = arith.constant 0 : index
    %32 = vector.load %arg5[%c0_6, %c0_7, %c0_8] : memref<1x8x16xf32, #tpu.memory_space<vmem>>, vector<1x8x16xf32>
    %33 = vector.shape_cast %32 : vector<1x8x16xf32> to vector<8x16xf32>
    %34 = vector.shape_cast %31 : vector<8x16xf32> to vector<1x8x16xf32>
    tpu.vector_store %arg5[%c0_6, %c0_7, %c0_8], %34 {strides = array<i32>} : memref<1x8x16xf32, #tpu.memory_space<vmem>>, vector<1x8x16xf32>,
    return
  }
  func.func @transform_0(%arg0: i32, %arg1: i32) -> (i32, i32, i32) {
    %c0_i32 = arith.constant 0 : i32
    %c0_i32_0 = arith.constant 0 : i32
    return %arg0, %c0_i32, %arg1 : i32, i32, i32
  }
  func.func @transform_1(%arg0: i32, %arg1: i32) -> (i32, i32) {
    %c0_i32 = arith.constant 0 : i32
    %c0_i32_0 = arith.constant 0 : i32
    %c0_i32_1 = arith.constant 0 : i32
    return %c0_i32, %c0_i32_0 : i32, i32
  }
  func.func @transform_2(%arg0: i32, %arg1: i32) -> (i32, i32) {
    %c0_i32 = arith.constant 0 : i32
    %c0_i32_0 = arith.constant 0 : i32
    %c0_i32_1 = arith.constant 0 : i32
    return %c0_i32, %c0_i32_0 : i32, i32
  }
  func.func @transform_3(%arg0: i32, %arg1: i32) -> (i32, i32, i32) {
    %c0_i32 = arith.constant 0 : i32
    %c0_i32_0 = arith.constant 0 : i32
    return %arg0, %c0_i32, %arg1 : i32, i32, i32
  }
}

module attributes {stable_mosaic.version = 11 : i64} {
  func.func @_pointwise_conv_relu_kernel(%arg0: i32, %arg1: i32, %arg2: memref<1x4x64xf32, #tpu.memory_space<vmem>>, %arg3: memref<8x4xf32, #tpu.memory_space<vmem>>, %arg4: memref<8x1xf32, #tpu.memory_space<vmem>>, %arg5: memref<1x8x64xf32, #tpu.memory_space<vmem>>) attributes {dimension_semantics = [#tpu.dimension_semantics<parallel>, #tpu.dimension_semantics<parallel>], iteration_bounds = array<i64: 2, 1>, scalar_prefetch = 0 : i64, scratch_operands = 0 : i64, tpu.core_type = #tpu.core_type<tc>, window_params = [{transform_indices = @transform_0, window_bounds = array<i64: 1, 4, 64>}, {pipeline_mode = #tpu.pipeline_mode<synchronous>, transform_indices = @transform_1, window_bounds = array<i64: 8, 4>}, {pipeline_mode = #tpu.pipeline_mode<synchronous>, transform_indices = @transform_2, window_bounds = array<i64: 8, 1>}, {transform_indices = @transform_3, window_bounds = array<i64: 1, 8, 64>}]} {
    %c0 = arith.constant 0 : index
    %c0_0 = arith.constant 0 : index
    %c0_1 = arith.constant 0 : index
    %0 = vector.load %arg2[%c0, %c0_0, %c0_1] : memref<1x4x64xf32, #tpu.memory_space<vmem>>, vector<1x4x64xf32>
    %1 = vector.shape_cast %0 : vector<1x4x64xf32> to vector<4x64xf32>
    %c0_2 = arith.constant 0 : index
    %c0_3 = arith.constant 0 : index
    %2 = vector.load %arg3[%c0_2, %c0_3] : memref<8x4xf32, #tpu.memory_space<vmem>>, vector<8x4xf32>
    %c0_4 = arith.constant 0 : index
    %c0_5 = arith.constant 0 : index
    %3 = vector.load %arg4[%c0_4, %c0_5] : memref<8x1xf32, #tpu.memory_space<vmem>>, vector<8x1xf32>
    %4 = vector.shape_cast %3 : vector<8x1xf32> to vector<8x1xf32>
    %5 = vector.broadcast %4 : vector<8x1xf32> to vector<8x64xf32>
    %6 = vector.extract_strided_slice %2 {offsets = [0, 0], sizes = [8, 1], strides = [1, 1]} : vector<8x4xf32> to vector<8x1xf32>
    %7 = vector.extract_strided_slice %1 {offsets = [0, 0], sizes = [1, 64], strides = [1, 1]} : vector<4x64xf32> to vector<1x64xf32>
    %8 = vector.broadcast %6 : vector<8x1xf32> to vector<8x64xf32>
    %9 = vector.broadcast %7 : vector<1x64xf32> to vector<8x64xf32>
    %10 = arith.mulf %8, %9 : vector<8x64xf32>
    %11 = arith.addf %5, %10 : vector<8x64xf32>
    %12 = vector.extract_strided_slice %2 {offsets = [0, 1], sizes = [8, 1], strides = [1, 1]} : vector<8x4xf32> to vector<8x1xf32>
    %13 = vector.extract_strided_slice %1 {offsets = [1, 0], sizes = [1, 64], strides = [1, 1]} : vector<4x64xf32> to vector<1x64xf32>
    %14 = vector.broadcast %12 : vector<8x1xf32> to vector<8x64xf32>
    %15 = vector.broadcast %13 : vector<1x64xf32> to vector<8x64xf32>
    %16 = arith.mulf %14, %15 : vector<8x64xf32>
    %17 = arith.addf %11, %16 : vector<8x64xf32>
    %18 = vector.extract_strided_slice %2 {offsets = [0, 2], sizes = [8, 1], strides = [1, 1]} : vector<8x4xf32> to vector<8x1xf32>
    %19 = vector.extract_strided_slice %1 {offsets = [2, 0], sizes = [1, 64], strides = [1, 1]} : vector<4x64xf32> to vector<1x64xf32>
    %20 = vector.broadcast %18 : vector<8x1xf32> to vector<8x64xf32>
    %21 = vector.broadcast %19 : vector<1x64xf32> to vector<8x64xf32>
    %22 = arith.mulf %20, %21 : vector<8x64xf32>
    %23 = arith.addf %17, %22 : vector<8x64xf32>
    %24 = vector.extract_strided_slice %2 {offsets = [0, 3], sizes = [8, 1], strides = [1, 1]} : vector<8x4xf32> to vector<8x1xf32>
    %25 = vector.extract_strided_slice %1 {offsets = [3, 0], sizes = [1, 64], strides = [1, 1]} : vector<4x64xf32> to vector<1x64xf32>
    %26 = vector.broadcast %24 : vector<8x1xf32> to vector<8x64xf32>
    %27 = vector.broadcast %25 : vector<1x64xf32> to vector<8x64xf32>
    %28 = arith.mulf %26, %27 : vector<8x64xf32>
    %29 = arith.addf %23, %28 : vector<8x64xf32>
    %cst = arith.constant 0.000000e+00 : f32
    %30 = vector.broadcast %cst : f32 to vector<8x64xf32>
    %31 = arith.maximumf %29, %30 : vector<8x64xf32>
    %c0_6 = arith.constant 0 : index
    %c0_7 = arith.constant 0 : index
    %c0_8 = arith.constant 0 : index
    %32 = vector.load %arg5[%c0_6, %c0_7, %c0_8] : memref<1x8x64xf32, #tpu.memory_space<vmem>>, vector<1x8x64xf32>
    %33 = vector.shape_cast %32 : vector<1x8x64xf32> to vector<8x64xf32>
    %34 = vector.shape_cast %31 : vector<8x64xf32> to vector<1x8x64xf32>
    tpu.vector_store %arg5[%c0_6, %c0_7, %c0_8], %34 {strides = array<i32>} : memref<1x8x64xf32, #tpu.memory_space<vmem>>, vector<1x8x64xf32>,
    return
  }
  func.func @transform_0(%arg0: i32, %arg1: i32) -> (i32, i32, i32) {
    %c0_i32 = arith.constant 0 : i32
    %c0_i32_0 = arith.constant 0 : i32
    return %arg0, %c0_i32, %arg1 : i32, i32, i32
  }
  func.func @transform_1(%arg0: i32, %arg1: i32) -> (i32, i32) {
    %c0_i32 = arith.constant 0 : i32
    %c0_i32_0 = arith.constant 0 : i32
    %c0_i32_1 = arith.constant 0 : i32
    return %c0_i32, %c0_i32_0 : i32, i32
  }
  func.func @transform_2(%arg0: i32, %arg1: i32) -> (i32, i32) {
    %c0_i32 = arith.constant 0 : i32
    %c0_i32_0 = arith.constant 0 : i32
    %c0_i32_1 = arith.constant 0 : i32
    return %c0_i32, %c0_i32_0 : i32, i32
  }
  func.func @transform_3(%arg0: i32, %arg1: i32) -> (i32, i32, i32) {
    %c0_i32 = arith.constant 0 : i32
    %c0_i32_0 = arith.constant 0 : i32
    return %arg0, %c0_i32, %arg1 : i32, i32, i32
  }
}

</mosaic_0001>

<bundles_post_ra>
// kernel: _decoder_forward_jit.5
= control target key start
LH: loop header
LB: loop body
LE: loop exit
PB: predicated region body
PF: predicated region fallthrough
CT: control target
= control target key end

     0   :  { %s401_s12 = smov 0   ;;  %s403_s13 = smov 0   ;;  %s440_s0 = inlined_call_operand.vmem [shape: f32[2,4,16], index: 0, kind: input, shape index: {}]   ;;  %s441_s1 = inlined_call_operand.vmem [shape: f32[8,4], index: 1, kind: input, shape index: {}]   ;;  %s442_s2 = inlined_call_operand.vmem [shape: f32[8,1], index: 2, kind: input, shape index: {}]   ;;  %s443_s3 = inlined_call_operand.vmem [shape: f32[2,8,16], index: 3, kind: output, shape index: {}]  }
   0x1   :  { %s405_s14 = smov 0  }
   0x2 LB: > { %s25_s15 = sadd.s32 1, %s371_s13  ;;  %p315_p0 = scmp.ge.s32.totalorder %s375_s14, 1  ;;  %s375_s14 = sphi %s405_s14, %s13_s14   ;;  %s371_s13 = sphi %s403_s13, %s445_s13   ;;  %s367_s12 = sphi %s401_s12, %s444_s12  }
   0x3   : > { %p27_p1 = scmp.ge.s32.totalorder %s25_s15, 2  ;;  %p155_p2 = scmp.lt.s32.totalorder %s375_s14, 3 }
   0x5   : > { %s447_s15 = smov (%p27_p1, %s25_s15), 0  ;;  %p156_p3 = pnand %p315_p0, %p155_p2 }
   0x6   : > { %p183_p4 = scmp.lt.s32.totalorder (!%p156_p3), %s367_s12, 1 }
   0x7   : > { %159 = sbr.rel (%p156_p3) target bundleno = 148 (0x94), region = 32 }
   0xc   : > { %v198_v0 = vld [vmem:[%s441_s1] sm:$0xff]  ;;  %v377_v1 = vmov 0   ;;  %v378_v2 = vmov 1   ;;  %v379_v3 = vmov 3   ;;  %v380_v5 = vmov 2   ;;  %s449_s12 = smov (!%p183_p4, %s367_s12), 1 }
   0xd   : > { %348 = vset.pattern.permute.xlu0 %v377_v1  ;;  %349 = vset.pattern.permute.xlu1 %v378_v2  ;;  %v199_v4 = vld [vmem:[%s442_s2] sm:$0xff]  ;;  %s316_s20 = sshll.u32 %s449_s12, 2  ;;  %s317_s24 = sshll.u32 %s449_s12, 3  ;;  %vm235_vm0 = vcmask 130048  }
   0xe   : > { %207 = vperm.xlu0 %348, %v198_v0   ;;  %214 = vperm.xlu1 %349, %v198_v0   ;;  %s189_s23 = scalar_lea.vmem %s440_s0, %s316_s20  ;;  %s196_s27 = scalar_lea.vmem %s443_s3, %s317_s24 }
   0xf   : > { %351 = vset.pattern.permute.xlu2 %v379_v3  ;;  %v197_v7 = vld [vmem:[%s189_s23] sm:$0xf] }
  0x10   : > { %228 = vperm.xlu2 %351, %v198_v0   ;;  %v210_v9 = vperm.slane %v197_v7, 0  ;;  %v217_v10 = vperm.slane %v197_v7, 1  ;;  %v224_v11 = vperm.slane %v197_v7, 2  ;;  %v231_v13 = vperm.slane %v197_v7, 3 }
  0x16   : > { %202 = vperm.xlu0 %348, %v199_v4   ;;  %350 = vset.pattern.permute.xlu1 %v380_v5 }
  0x17   : > { %221 = vperm.xlu1 %350, %v198_v0  }
  0x1e   : > { %352 = vset.pattern.permute.xlu0 %v379_v3 }
  0x6a   : > { %v229_v15 = vpop.permute.xlu2 %228 }
  0x6b   : > { %v232_v21 = vmul.f32 %v231_v13, %v229_v15 }
  0x80   : > { %v208_v6 = vpop.permute.xlu0 %207  ;;  %v215_v8 = vpop.permute.xlu1 %214 }
  0x81   : > { %v211_v12 = vmul.f32 %v210_v9, %v208_v6  ;;  %v218_v16 = vmul.f32 %v217_v10, %v215_v8 }
  0x88   : > { %v203_v14 = vpop.permute.xlu0 %202 }
  0x89   : > { %v212_v17 = vadd.f32 %v211_v12, %v203_v14  ;;  %v222_v18 = vpop.permute.xlu1 %221 }
  0x8a   : > { %v225_v19 = vmul.f32 %v224_v11, %v222_v18 }
  0x8b   : > { %v219_v20 = vadd.f32 %v218_v16, %v212_v17 }
  0x8d   : > { %v226_v22 = vadd.f32 %v225_v19, %v219_v20 }
  0x8f   : > { %v233_v23 = vadd.f32 %v232_v21, %v226_v22 }
  0x91   : > { %v234_v24 = vmax.f32 %v233_v23, 0.0 }
  0x93   : > { %236 = vst.msk [vmem:[%s196_s27] sm:$0xff] %vm235_vm0, %v234_v24 }
  0x94 PF: > { %s13_s14 = sadd.s32 1, %s375_s14   ;;  %s444_s12 = smov %s371_s13 }
  0x95   : > { %p10_p5 = scmp.ge.s32.totalorder %s13_s14, 4   ;;  %s445_s13 = smov %s447_s15 }
  0x97   :  { %12 = sbr.rel (!%p10_p5) target bundleno = 2 (0x2), region = 62 }

// kernel: _decoder_forward_jit.3
= control target key start
LH: loop header
LB: loop body
LE: loop exit
PB: predicated region body
PF: predicated region fallthrough
CT: control target
= control target key end

     0   :  { %s461_s12 = smov 0   ;;  %s463_s13 = smov 0   ;;  %s504_s0 = inlined_call_operand.vmem [shape: f32[2,4,256], index: 0, kind: input, shape index: {}]   ;;  %s505_s1 = inlined_call_operand.vmem [shape: f32[8,4], index: 1, kind: input, shape index: {}]   ;;  %s506_s2 = inlined_call_operand.vmem [shape: f32[8,1], index: 2, kind: input, shape index: {}]   ;;  %s507_s3 = inlined_call_operand.vmem [shape: f32[2,8,256], index: 3, kind: output, shape index: {}]  }
   0x1   :  { %s465_s14 = smov 0  }
   0x2 LB: > { %s25_s15 = sadd.s32 1, %s431_s13  ;;  %p371_p0 = scmp.ge.s32.totalorder %s435_s14, 1  ;;  %s435_s14 = sphi %s465_s14, %s13_s14   ;;  %s431_s13 = sphi %s463_s13, %s509_s13   ;;  %s427_s12 = sphi %s461_s12, %s508_s12  }
   0x3   : > { %p27_p1 = scmp.ge.s32.totalorder %s25_s15, 2  ;;  %p158_p2 = scmp.lt.s32.totalorder %s435_s14, 3 }
   0x5   : > { %s511_s15 = smov (%p27_p1, %s25_s15), 0  ;;  %p159_p3 = pnand %p371_p0, %p158_p2 }
   0x6   : > { %p191_p4 = scmp.lt.s32.totalorder (!%p159_p3), %s427_s12, 1 }
   0x7   : > { %162 = sbr.rel (%p159_p3) target bundleno = 149 (0x95), region = 32 }
   0xc   : > { %v211_v0 = vld [vmem:[%s505_s1] sm:$0xff]  ;;  %v437_v1 = vmov 0   ;;  %v438_v2 = vmov 1   ;;  %v439_v3 = vmov 3   ;;  %v440_v5 = vmov 2   ;;  %s513_s12 = smov (!%p191_p4, %s427_s12), 1 }
   0xd   : > { %408 = vset.pattern.permute.xlu0 %v437_v1  ;;  %409 = vset.pattern.permute.xlu1 %v438_v2  ;;  %v212_v4 = vld [vmem:[%s506_s2] sm:$0xff]  ;;  %s378_s20 = sshll.u32 %s513_s12, 3  ;;  %s379_s24 = sshll.u32 %s513_s12, 4 }
   0xe   : > { %220 = vperm.xlu0 %408, %v211_v0   ;;  %235 = vperm.xlu1 %409, %v211_v0   ;;  %s198_s23 = scalar_lea.vmem %s504_s0, %s378_s20  ;;  %s208_s27 = scalar_lea.vmem %s507_s3, %s379_s24 }
   0xf   : > { %411 = vset.pattern.permute.xlu2 %v439_v3  ;;  %v210_v6 = vld [vmem:[%s198_s23] sm:$0xff] }
  0x10   : > { %263 = vperm.xlu2 %411, %v211_v0   ;;  %v224_v7 = vperm.slane %v210_v6, 0  ;;  %v225_v8 = vperm.slane %v210_v6, 4  ;;  %v238_v11 = vperm.slane %v210_v6, 1  ;;  %v239_v12 = vperm.slane %v210_v6, 5 }
  0x11   : > { %v252_v13 = vperm.slane %v210_v6, 2  ;;  %v253_v14 = vperm.slane %v210_v6, 6  ;;  %v266_v17 = vperm.slane %v210_v6, 3  ;;  %v267_v18 = vperm.slane %v210_v6, 7 }
  0x12   : > { %v228_v15 = vperm.slane %v224_v7, 0  ;;  %v229_v16 = vperm.slane %v225_v8, 0  ;;  %v242_v19 = vperm.slane %v238_v11, 1  ;;  %v243_v20 = vperm.slane %v239_v12, 1 }
  0x13   : > { %v256_v21 = vperm.slane %v252_v13, 2  ;;  %v257_v22 = vperm.slane %v253_v14, 2  ;;  %v270_v25 = vperm.slane %v266_v17, 3  ;;  %v271_v26 = vperm.slane %v267_v18, 3 }
  0x16   : > { %215 = vperm.xlu0 %408, %v212_v4   ;;  %410 = vset.pattern.permute.xlu1 %v440_v5 }
  0x17   : > { %249 = vperm.xlu1 %410, %v211_v0  }
  0x1e   : > { %412 = vset.pattern.permute.xlu0 %v439_v3 }
  0x6a   : > { %v264_v28 = vpop.permute.xlu2 %263 }
  0x6b   : > { %v272_v38 = vmul.f32 %v270_v25, %v264_v28  ;;  %v273_v39 = vmul.f32 %v271_v26, %v264_v28 }
  0x80   : > { %v221_v9 = vpop.permute.xlu0 %220  ;;  %v236_v10 = vpop.permute.xlu1 %235 }
  0x81   : > { %v230_v23 = vmul.f32 %v228_v15, %v221_v9  ;;  %v231_v24 = vmul.f32 %v229_v16, %v221_v9  ;;  %v244_v29 = vmul.f32 %v242_v19, %v236_v10  ;;  %v245_v30 = vmul.f32 %v243_v20, %v236_v10 }
  0x88   : > { %v216_v27 = vpop.permute.xlu0 %215 }
  0x89   : > { %v232_v31 = vadd.f32 %v230_v23, %v216_v27  ;;  %v233_v32 = vadd.f32 %v231_v24, %v216_v27  ;;  %v250_v33 = vpop.permute.xlu1 %249 }
  0x8a   : > { %v258_v34 = vmul.f32 %v256_v21, %v250_v33  ;;  %v259_v35 = vmul.f32 %v257_v22, %v250_v33 }
  0x8b   : > { %v246_v36 = vadd.f32 %v244_v29, %v232_v31  ;;  %v247_v37 = vadd.f32 %v245_v30, %v233_v32 }
  0x8d   : > { %v260_v40 = vadd.f32 %v258_v34, %v246_v36  ;;  %v261_v41 = vadd.f32 %v259_v35, %v247_v37 }
  0x8f   : > { %v274_v42 = vadd.f32 %v272_v38, %v260_v40  ;;  %v275_v43 = vadd.f32 %v273_v39, %v261_v41 }
  0x91   : > { %v276_v44 = vmax.f32 %v274_v42, 0.0  ;;  %v277_v45 = vmax.f32 %v275_v43, 0.0 }
  0x93   : > { %278 = vst [vmem:[%s208_s27] sm:$0xff] %v276_v44 }
  0x94   : > { %279 = vst [vmem:[%s208_s27 + $0x8] sm:$0xff] %v277_v45 }
  0x95 PF: > { %s13_s14 = sadd.s32 1, %s435_s14   ;;  %s508_s12 = smov %s431_s13 }
  0x96   : > { %p10_p5 = scmp.ge.s32.totalorder %s13_s14, 4   ;;  %s509_s13 = smov %s511_s15 }
  0x98   :  { %12 = sbr.rel (!%p10_p5) target bundleno = 2 (0x2), region = 62 }

// kernel: _decoder_forward_jit.4
= control target key start
LH: loop header
LB: loop body
LE: loop exit
PB: predicated region body
PF: predicated region fallthrough
CT: control target
= control target key end

     0   :  { %s401_s12 = smov 0   ;;  %s403_s13 = smov 0   ;;  %s440_s0 = inlined_call_operand.vmem [shape: f32[2,4,64], index: 0, kind: input, shape index: {}]   ;;  %s441_s1 = inlined_call_operand.vmem [shape: f32[8,4], index: 1, kind: input, shape index: {}]   ;;  %s442_s2 = inlined_call_operand.vmem [shape: f32[8,1], index: 2, kind: input, shape index: {}]   ;;  %s443_s3 = inlined_call_operand.vmem [shape: f32[2,8,64], index: 3, kind: output, shape index: {}]  }
   0x1   :  { %s405_s14 = smov 0  }
   0x2 LB: > { %s25_s15 = sadd.s32 1, %s371_s13  ;;  %p315_p0 = scmp.ge.s32.totalorder %s375_s14, 1  ;;  %s375_s14 = sphi %s405_s14, %s13_s14   ;;  %s371_s13 = sphi %s403_s13, %s445_s13   ;;  %s367_s12 = sphi %s401_s12, %s444_s12  }
   0x3   : > { %p27_p1 = scmp.ge.s32.totalorder %s25_s15, 2  ;;  %p155_p2 = scmp.lt.s32.totalorder %s375_s14, 3 }
   0x5   : > { %s447_s15 = smov (%p27_p1, %s25_s15), 0  ;;  %p156_p3 = pnand %p315_p0, %p155_p2 }
   0x6   : > { %p183_p4 = scmp.lt.s32.totalorder (!%p156_p3), %s367_s12, 1 }
   0x7   : > { %159 = sbr.rel (%p156_p3) target bundleno = 148 (0x94), region = 32 }
   0xc   : > { %v198_v0 = vld [vmem:[%s441_s1] sm:$0xff]  ;;  %v377_v1 = vmov 0   ;;  %v378_v2 = vmov 1   ;;  %v379_v3 = vmov 3   ;;  %v380_v5 = vmov 2   ;;  %s449_s12 = smov (!%p183_p4, %s367_s12), 1 }
   0xd   : > { %348 = vset.pattern.permute.xlu0 %v377_v1  ;;  %349 = vset.pattern.permute.xlu1 %v378_v2  ;;  %v199_v4 = vld [vmem:[%s442_s2] sm:$0xff]  ;;  %s316_s20 = sshll.u32 %s449_s12, 2  ;;  %s317_s24 = sshll.u32 %s449_s12, 3  ;;  %vm235_vm0 = vcmask 523264  }
   0xe   : > { %207 = vperm.xlu0 %348, %v198_v0   ;;  %214 = vperm.xlu1 %349, %v198_v0   ;;  %s189_s23 = scalar_lea.vmem %s440_s0, %s316_s20  ;;  %s196_s27 = scalar_lea.vmem %s443_s3, %s317_s24 }
   0xf   : > { %351 = vset.pattern.permute.xlu2 %v379_v3  ;;  %v197_v7 = vld [vmem:[%s189_s23] sm:$0xf] }
  0x10   : > { %228 = vperm.xlu2 %351, %v198_v0   ;;  %v210_v9 = vperm.slane %v197_v7, 0  ;;  %v217_v10 = vperm.slane %v197_v7, 1  ;;  %v224_v11 = vperm.slane %v197_v7, 2  ;;  %v231_v13 = vperm.slane %v197_v7, 3 }
  0x16   : > { %202 = vperm.xlu0 %348, %v199_v4   ;;  %350 = vset.pattern.permute.xlu1 %v380_v5 }
  0x17   : > { %221 = vperm.xlu1 %350, %v198_v0  }
  0x1e   : > { %352 = vset.pattern.permute.xlu0 %v379_v3 }
  0x6a   : > { %v229_v15 = vpop.permute.xlu2 %228 }
  0x6b   : > { %v232_v21 = vmul.f32 %v231_v13, %v229_v15 }
  0x80   : > { %v208_v6 = vpop.permute.xlu0 %207  ;;  %v215_v8 = vpop.permute.xlu1 %214 }
  0x81   : > { %v211_v12 = vmul.f32 %v210_v9, %v208_v6  ;;  %v218_v16 = vmul.f32 %v217_v10, %v215_v8 }
  0x88   : > { %v203_v14 = vpop.permute.xlu0 %202 }
  0x89   : > { %v212_v17 = vadd.f32 %v211_v12, %v203_v14  ;;  %v222_v18 = vpop.permute.xlu1 %221 }
  0x8a   : > { %v225_v19 = vmul.f32 %v224_v11, %v222_v18 }
  0x8b   : > { %v219_v20 = vadd.f32 %v218_v16, %v212_v17 }
  0x8d   : > { %v226_v22 = vadd.f32 %v225_v19, %v219_v20 }
  0x8f   : > { %v233_v23 = vadd.f32 %v232_v21, %v226_v22 }
  0x91   : > { %v234_v24 = vmax.f32 %v233_v23, 0.0 }
  0x93   : > { %236 = vst.msk [vmem:[%s196_s27] sm:$0xff] %vm235_vm0, %v234_v24 }
  0x94 PF: > { %s13_s14 = sadd.s32 1, %s375_s14   ;;  %s444_s12 = smov %s371_s13 }
  0x95   : > { %p10_p5 = scmp.ge.s32.totalorder %s13_s14, 4   ;;  %s445_s13 = smov %s447_s15 }
  0x97   :  { %12 = sbr.rel (!%p10_p5) target bundleno = 2 (0x2), region = 62 }

</bundles_post_ra>
